<compile_context>
chip_gen: v5e
topology: v5e:2x2
jax: 0.10.0
libtpu: 0.0.40
codegen_flags: <defaults>
</compile_context>

<pallas_src>
import jax
import jax.numpy as jnp
from jax.experimental import pallas as pl
from jax.experimental.pallas import tpu as pltpu


def _round_up(x, m):
    return ((x + m - 1) // m) * m


def _pick_tile(dim, max_tile, align):
    """Pick a block size for one dim: the full dim if it fits (legal as a
    full-extent block, no padding), else a dividing multiple of `align`, else
    the multiple of `align` (>=128, <=max_tile) that minimizes padding."""
    if dim <= max_tile:
        return dim
    floor = max(align, 128)
    best, best_pad = max_tile, _round_up(dim, max_tile) - dim
    t = max_tile
    while t >= floor:
        pad = _round_up(dim, t) - dim
        if pad == 0:
            return t
        if pad < best_pad:
            best, best_pad = t, pad
        t -= align
    return best


# ----------------------------------------------------------------------------
# Kernel 1: wrapped-module forward (Linear: y = x @ W + b), tiled on the MXU.
# Output block is the accumulator (index_map ignores k -> VMEM-resident).
# ----------------------------------------------------------------------------
def _linear_kernel(x_ref, w_ref, b_ref, o_ref):
    k = pl.program_id(2)

    @pl.when(k == 0)
    def _init():
        o_ref[...] = jnp.zeros_like(o_ref)

    o_ref[...] += jnp.dot(
        x_ref[...], w_ref[...], preferred_element_type=jnp.float32
    )

    # Bias added exactly once, on the final K step.
    @pl.when(k == pl.num_programs(2) - 1)
    def _finish():
        o_ref[...] += b_ref[...]


def linear_forward(x, w, b, *, tm_max=512, tn_max=512, tk_max=512):
    """x: [B, D_in] f32, w: [D_in, D_out] f32, b: [D_out] f32 -> [B, D_out]."""
    B, D_in = x.shape
    D_out = w.shape[1]

    tm = _pick_tile(B, tm_max, 8)       # sublane-aligned
    tk = _pick_tile(D_in, tk_max, 128)  # lane-aligned
    tn = _pick_tile(D_out, tn_max, 128)

    B_p = _round_up(B, tm)
    K_p = _round_up(D_in, tk)
    N_p = _round_up(D_out, tn)

    # Pad only when the chosen tiles do not divide (zero-padding along K keeps
    # the matmul exact; the common path passes w unpadded).
    x_p = x if (B_p == B and K_p == D_in) else jnp.pad(
        x, ((0, B_p - B), (0, K_p - D_in)))
    w_p = w if (K_p == D_in and N_p == D_out) else jnp.pad(
        w, ((0, K_p - D_in), (0, N_p - D_out)))
    b2 = b.reshape(1, D_out)
    b_p = b2 if N_p == D_out else jnp.pad(b2, ((0, 0), (0, N_p - D_out)))

    grid = (B_p // tm, N_p // tn, K_p // tk)
    itemsize = x.dtype.itemsize

    out = pl.pallas_call(
        _linear_kernel,
        out_shape=jax.ShapeDtypeStruct((B_p, N_p), jnp.float32),
        grid=grid,
        in_specs=[
            pl.BlockSpec((tm, tk), lambda i, j, k: (i, k)),
            pl.BlockSpec((tk, tn), lambda i, j, k: (k, j)),
            pl.BlockSpec((1, tn), lambda i, j, k: (0, j)),
        ],
        out_specs=pl.BlockSpec((tm, tn), lambda i, j, k: (i, j)),
        compiler_params=pltpu.CompilerParams(
            dimension_semantics=("parallel", "parallel", "arbitrary"),
        ),
        cost_estimate=pl.CostEstimate(
            flops=2 * B_p * K_p * N_p,
            transcendentals=0,
            bytes_accessed=itemsize * (
                B_p * K_p * (N_p // tn)      # x re-streamed once per N tile
                + K_p * N_p * (B_p // tm)    # w re-streamed once per M tile
                + N_p * (B_p // tm)          # bias re-streamed once per M tile
                + B_p * N_p                  # output written once
            ),
        ),
    )(x_p, w_p, b_p)

    if B_p != B or N_p != D_out:
        out = out[:B, :D_out]
    return out.astype(x.dtype)


# ----------------------------------------------------------------------------
# Kernel 2: allreduce_params() numerics.
#   coalesced = all_reduce_sum(flat_grads); coalesced /= world_size
# Streaming mean over W separate per-replica buffers, (rows, 128) blocks,
# f32 accumulation, output aliased in place onto input 0.
# ----------------------------------------------------------------------------
def _make_allreduce_kernel(world_size):
    inv = 1.0 / world_size

    def kernel(*refs):
        g_refs, o_ref = refs[:-1], refs[-1]
        acc = g_refs[0][...].astype(jnp.float32)
        for g in g_refs[1:]:
            acc = acc + g[...].astype(jnp.float32)
        o_ref[...] = (acc * inv).astype(o_ref.dtype)

    return kernel


def allreduce_mean(per_replica_flat, *, rows_per_block=1024):
    """per_replica_flat: list of W flat [N] arrays -> [N] mean (f32 accumulate)."""
    W = len(per_replica_flat)
    N = int(per_replica_flat[0].shape[0])
    dtype = per_replica_flat[0].dtype
    itemsize = jnp.dtype(dtype).itemsize

    lanes = 128
    rows_total = pl.cdiv(N, lanes)

    # Block rows: multiple of 8, no bigger than the (padded) bucket, and small
    # enough that (W inputs + 1 output) double-buffered stays <= ~16 MiB VMEM.
    vmem_budget = 16 * 1024 * 1024
    budget_rows = max(8, (vmem_budget // ((W + 1) * 2 * lanes * itemsize)) // 8 * 8)
    rows_blk = min(rows_per_block, _round_up(rows_total, 8), budget_rows)
    rows_p = _round_up(rows_total, rows_blk)
    N_p = rows_p * lanes

    def prep(g):
        if N_p != N:
            g = jnp.pad(g, (0, N_p - N))
        return g.reshape(rows_p, lanes)

    gs = [prep(g) for g in per_replica_flat]

    out = pl.pallas_call(
        _make_allreduce_kernel(W),
        out_shape=jax.ShapeDtypeStruct((rows_p, lanes), dtype),
        grid=(rows_p // rows_blk,),
        in_specs=[pl.BlockSpec((rows_blk, lanes), lambda i: (i, 0))
                  for _ in range(W)],
        out_specs=pl.BlockSpec((rows_blk, lanes), lambda i: (i, 0)),
        # In-place: averaged bucket overwrites replica-0's (wrapper-local) buffer.
        input_output_aliases={0: 0},
        compiler_params=pltpu.CompilerParams(
            dimension_semantics=("parallel",),
        ),
        cost_estimate=pl.CostEstimate(
            flops=W * rows_p * lanes,
            transcendentals=0,
            bytes_accessed=(W + 1) * rows_p * lanes * itemsize,
        ),
    )(*gs)
    return out.reshape(-1)[:N]


# ----------------------------------------------------------------------------
# Glue: flatten / unflatten dense tensors (as _flatten_dense_tensors /
# _unflatten_dense_tensors in the PyTorch module).
# ----------------------------------------------------------------------------
def flatten_dense_tensors(tensors):
    if len(tensors) == 1:
        return tensors[0].reshape(-1)
    return jnp.concatenate([t.reshape(-1) for t in tensors], axis=0)


def unflatten_dense_tensors(flat, tensors):
    outputs = []
    offset = 0
    for t in tensors:
        n = t.size
        outputs.append(flat[offset:offset + n].reshape(t.shape))
        offset += n
    return tuple(outputs)


# ----------------------------------------------------------------------------
# DistributedDataParallel analogue.
# ----------------------------------------------------------------------------
class PallasDDP:
    """Wraps a Linear module; forward() sets needs_reduction and dispatches to
    the wrapped module's forward via the tiled Pallas matmul kernel. The
    rank-0 parameter broadcast in __init__ is modeled by all simulated
    replicas sharing the same (deterministic) parameter values."""

    def __init__(self, w, b, world_size=4):
        self.w = w                      # [D_in, D_out] (PyTorch stores [D_out, D_in])
        self.b = b                      # [D_out]
        self.world_size = world_size
        self.needs_reduction = False

    def forward(self, x):
        self.needs_reduction = True
        return linear_forward(x, self.w, self.b)

    def allreduce_params(self, per_replica_grads):
        """per_replica_grads: list (len=world_size) of [grad_w, grad_b].
        Returns averaged (grad_w, grad_b), matching the PyTorch hook semantics."""
        if not self.needs_reduction:
            return None
        self.needs_reduction = False
        # One bucket per replica; no [W, N] stack is ever materialized in HBM.
        flats = [flatten_dense_tensors(g) for g in per_replica_grads]
        coalesced = allreduce_mean(flats)           # sum / world_size, length N
        return unflatten_dense_tensors(coalesced, per_replica_grads[0])


if __name__ == "__main__":
    key = jax.random.PRNGKey(0)
    k_x, k_w, k_b, k_g = jax.random.split(key, 4)

    B, D_in, D_out = 2, 32, 32
    world_size = 4

    x = jax.random.normal(k_x, (B, D_in), dtype=jnp.float32)
    # PyTorch Linear weight is [D_out, D_in]; store transposed [D_in, D_out].
    w = jax.random.normal(k_w, (D_out, D_in), dtype=jnp.float32).T * 0.1
    b = jax.random.normal(k_b, (D_out,), dtype=jnp.float32) * 0.1

    ddp = PallasDDP(w, b, world_size=world_size)

    # Forward pass (sets needs_reduction, runs the wrapped module's forward).
    y = ddp.forward(x)
    y = jax.block_until_ready(y)

    y_ref = x @ w + b[None, :]
    assert y.shape == (B, D_out)
    assert jnp.allclose(y, y_ref, atol=1e-5, rtol=1e-5)

    # Simulated per-replica gradients for the bucket all-reduce.
    gkeys = jax.random.split(k_g, world_size)
    per_replica_grads = [
        [
            jax.random.normal(gk, (D_in, D_out), dtype=jnp.float32),
            jax.random.normal(jax.random.fold_in(gk, 1), (D_out,), dtype=jnp.float32),
        ]
        for gk in gkeys
    ]
    gw_avg, gb_avg = ddp.allreduce_params(per_replica_grads)
    gw_avg = jax.block_until_ready(gw_avg)

    gw_ref = sum(g[0] for g in per_replica_grads) / world_size
    gb_ref = sum(g[1] for g in per_replica_grads) / world_size
    assert gw_avg.shape == (D_in, D_out) and gb_avg.shape == (D_out,)
    assert jnp.allclose(gw_avg, gw_ref, atol=1e-5, rtol=1e-5)
    assert jnp.allclose(gb_avg, gb_ref, atol=1e-5, rtol=1e-5)
    assert ddp.needs_reduction is False

    print("KERNEL_OK")
</pallas_src>

<mosaic_0001>
module attributes {stable_mosaic.version = 11 : i64} {
  func.func @_linear_kernel(%arg0: i32, %arg1: i32, %arg2: i32, %arg3: memref<2x32xf32, #tpu.memory_space<vmem>>, %arg4: memref<32x32xf32, #tpu.memory_space<vmem>>, %arg5: memref<1x32xf32, #tpu.memory_space<vmem>>, %arg6: memref<2x32xf32, #tpu.memory_space<vmem>>) attributes {dimension_semantics = [#tpu.dimension_semantics<parallel>, #tpu.dimension_semantics<parallel>, #tpu.dimension_semantics<arbitrary>], iteration_bounds = array<i64: 1, 1, 1>, scalar_prefetch = 0 : i64, scratch_operands = 0 : i64, tpu.core_type = #tpu.core_type<tc>, window_params = [{transform_indices = @transform_0, window_bounds = array<i64: 2, 32>}, {transform_indices = @transform_1, window_bounds = array<i64: 32, 32>}, {transform_indices = @transform_2, window_bounds = array<i64: 1, 32>}, {transform_indices = @transform_3, window_bounds = array<i64: 2, 32>}]} {
    %c0_i32 = arith.constant 0 : i32
    %0 = arith.cmpi eq, %arg2, %c0_i32 : i32
    %1 = arith.extui %0 : i1 to i32
    %c0_i32_0 = arith.constant 0 : i32
    %2 = arith.cmpi ne, %1, %c0_i32_0 : i32
    scf.if %2 {
      %cst_10 = arith.constant 0.000000e+00 : f32
      %12 = vector.broadcast %cst_10 : f32 to vector<2x32xf32>
      %c0_11 = arith.constant 0 : index
      %c0_12 = arith.constant 0 : index
      %13 = vector.load %arg6[%c0_11, %c0_12] : memref<2x32xf32, #tpu.memory_space<vmem>>, vector<2x32xf32>
      tpu.vector_store %arg6[%c0_11, %c0_12], %12 {strides = array<i32>} : memref<2x32xf32, #tpu.memory_space<vmem>>, vector<2x32xf32>,
    } else {
    }
    %c0 = arith.constant 0 : index
    %c0_1 = arith.constant 0 : index
    %3 = vector.load %arg6[%c0, %c0_1] : memref<2x32xf32, #tpu.memory_space<vmem>>, vector<2x32xf32>
    %c0_2 = arith.constant 0 : index
    %c0_3 = arith.constant 0 : index
    %4 = vector.load %arg3[%c0_2, %c0_3] : memref<2x32xf32, #tpu.memory_space<vmem>>, vector<2x32xf32>
    %c0_4 = arith.constant 0 : index
    %c0_5 = arith.constant 0 : index
    %5 = vector.load %arg4[%c0_4, %c0_5] : memref<32x32xf32, #tpu.memory_space<vmem>>, vector<32x32xf32>
    %cst = arith.constant dense<0.000000e+00> : vector<2x32xf32>
    %6 = tpu.matmul %4, %5, %cst {dimension_numbers = #tpu.dot_dimension_numbers<[1], [0], [0], [1], [0, 0, 1, 1], [], []>} : vector<2x32xf32>, vector<32x32xf32>, vector<2x32xf32> -> vector<2x32xf32>
    %7 = arith.addf %3, %6 : vector<2x32xf32>
    %c0_6 = arith.constant 0 : index
    %c0_7 = arith.constant 0 : index
    %8 = vector.load %arg6[%c0_6, %c0_7] : memref<2x32xf32, #tpu.memory_space<vmem>>, vector<2x32xf32>
    tpu.vector_store %arg6[%c0_6, %c0_7], %7 {strides = array<i32>} : memref<2x32xf32, #tpu.memory_space<vmem>>, vector<2x32xf32>,
    %c0_i32_8 = arith.constant 0 : i32
    %9 = arith.cmpi eq, %arg2, %c0_i32_8 : i32
    %10 = arith.extui %9 : i1 to i32
    %c0_i32_9 = arith.constant 0 : i32
    %11 = arith.cmpi ne, %10, %c0_i32_9 : i32
    scf.if %11 {
      %c0_10 = arith.constant 0 : index
      %c0_11 = arith.constant 0 : index
      %12 = vector.load %arg6[%c0_10, %c0_11] : memref<2x32xf32, #tpu.memory_space<vmem>>, vector<2x32xf32>
      %c0_12 = arith.constant 0 : index
      %c0_13 = arith.constant 0 : index
      %13 = vector.load %arg5[%c0_12, %c0_13] : memref<1x32xf32, #tpu.memory_space<vmem>>, vector<1x32xf32>
      %14 = vector.broadcast %13 : vector<1x32xf32> to vector<2x32xf32>
      %15 = arith.addf %12, %14 : vector<2x32xf32>
      %c0_14 = arith.constant 0 : index
      %c0_15 = arith.constant 0 : index
      %16 = vector.load %arg6[%c0_14, %c0_15] : memref<2x32xf32, #tpu.memory_space<vmem>>, vector<2x32xf32>
      tpu.vector_store %arg6[%c0_14, %c0_15], %15 {strides = array<i32>} : memref<2x32xf32, #tpu.memory_space<vmem>>, vector<2x32xf32>,
    } else {
    }
    return
  }
  func.func @transform_0(%arg0: i32, %arg1: i32, %arg2: i32) -> (i32, i32) {
    %c0_i32 = arith.constant 0 : i32
    return %arg0, %arg2 : i32, i32
  }
  func.func @transform_1(%arg0: i32, %arg1: i32, %arg2: i32) -> (i32, i32) {
    %c0_i32 = arith.constant 0 : i32
    return %arg2, %arg1 : i32, i32
  }
  func.func @transform_2(%arg0: i32, %arg1: i32, %arg2: i32) -> (i32, i32) {
    %c0_i32 = arith.constant 0 : i32
    %c0_i32_0 = arith.constant 0 : i32
    return %c0_i32, %arg1 : i32, i32
  }
  func.func @transform_3(%arg0: i32, %arg1: i32, %arg2: i32) -> (i32, i32) {
    %c0_i32 = arith.constant 0 : i32
    return %arg0, %arg1 : i32, i32
  }
}

</mosaic_0001>

<bundles_post_ra>
// kernel: tpu_custom_call.1
= control target key start
LH: loop header
LB: loop body
LE: loop exit
PB: predicated region body
PF: predicated region fallthrough
CT: control target
= control target key end

     0   :  { %8 = vsyncpa [#allocation3], 0  ;;  %s239_s0 = inlined_call_operand.hbm [shape: f32[2,32], index: 0, kind: input, shape index: {}]   ;;  %s240_s1 = inlined_call_operand.hbm [shape: f32[32,32], index: 1, kind: input, shape index: {}]   ;;  %s241_s2 = inlined_call_operand.vmem [shape: f32[1,32], index: 2, kind: input, shape index: {}]   ;;  %s242_s3 = inlined_call_operand.hbm [shape: f32[2,32], index: 3, kind: output, shape index: {}]  }
   0x1   :  { %9 = vsyncpa [#allocation6], 0 }
   0x2   :  { %10 = vsyncpa [#allocation4], 0  ;;  %s16_s14 = sshll.u32 %s239_s0, 4  ;;  %s198_s15 = smov [#allocation2]   ;;  %s17_s14 = int_to_ptr.hbm [resolvable:$true] %s16_s14 }
   0x3   :  { %s18_s16 = sshll.u32 %s198_s15, 4  ;;  %s26_s19 = sshll.u32 %s240_s1, 4  ;;  %s19_s16 = int_to_ptr.vmem [resolvable:$true] %s18_s16  ;;  %s27_s19 = int_to_ptr.hbm [resolvable:$true] %s26_s19 }
   0x4   :  { %21 = dma.hbm_to_vmem [thread:$0]  %s17_s14, 32, %s19_s16, [#allocation3]  }
   0x5   :  { %s199_s20 = smov [#allocation5]   ;;  %s200_s22 = smov 128  }
   0x6   :  { %s28_s21 = sshll.u32 %s199_s20, 4  ;;  %s201_s23 = smov 8   ;;  %s29_s21 = int_to_ptr.vmem [resolvable:$true] %s28_s21 }
   0x7   :  { %34 = dma.hbm_to_vmem [thread:$0]  %s27_s19, 512, %s29_s21, [#allocation6], %s200_s22, %s200_s22, %s201_s23  }
   0x8   :  { %192 = dma.done.wait [#allocation3], 32  }
   0x9   :  { %193 = vsyncadd [#allocation3], 4294967264 }
   0xa   :  { %194 = dma.done.wait [#allocation6], 512  }
   0xb   :  { %195 = vsyncadd [#allocation6], 4294966784  ;;  %vm49_vm0 = vcmask 254976   ;;  %v202_v0 = vmov 0.0   ;;  %v56_v1 = vld [vmem:[#allocation5 + $0x18] sm:$0xff]  ;;  %v55_v2 = vld [vmem:[#allocation5 + $0x10] sm:$0xff] }
   0xc   :  { %50 = vst.msk [vmem:[#allocation7] sm:$0x3] %vm49_vm0, %v202_v0  ;;  %73 = vmatpush.msra.mxu0 %v56_v1  ;;  %v54_v3 = vld [vmem:[#allocation5 + $0x8] sm:$0xff]  ;;  %v53_v4 = vld [vmem:[#allocation5] sm:$0xff]  ;;  %v52_v5 = vld [vmem:[#allocation2] sm:$0x3] }
   0xd   :  { %vm57_vm1 = vcmask 261120   ;;  %v119_v9 = vld [vmem:[%s241_s2] ss:$0 sm:$0xff]  ;;  %s203_s24 = smov [#allocation7]   ;;  %s101_s28 = sshll.u32 %s242_s3, 4  ;;  %s102_s28 = int_to_ptr.hbm [resolvable:$true] %s101_s28 }
   0xe   :  { %74 = vmatpush.msra.mxu0 %v55_v2  ;;  %s99_s25 = sshll.u32 %s203_s24, 4  ;;  %s100_s25 = int_to_ptr.vmem [resolvable:$true] %s99_s25 }
  0x10   :  { %75 = vmatpush.msra.mxu0 %v54_v3 }
  0x12   :  { %76 = vmatpush.msra.mxu0 %v53_v4 }
  0x13   :  { %112 = vmatmul.msk.f32.vlgmr.msra.gmra.mxu0 %vm57_vm1, %v52_v5  ;;  %v51_v6 = vld [vmem:[#allocation7] sm:$0x3] }
  0x90   :  { %v78_v7 = vpop.f32.mrf.mxu0 }
  0x91   :  { %v81_v8 = vadd.f32 %v78_v7, %v51_v6 }
  0x93   :  { %83 = vst.msk [vmem:[#allocation7] sm:$0x3] %vm49_vm0, %v81_v8 }
  0x9a   :  { %v87_v10 = vld [vmem:[#allocation7] sm:$0x3] }
  0x9b   :  { %v92_v11 = vadd.f32 %v119_v9, %v87_v10 }
  0x9d   :  { %93 = vst.msk [vmem:[#allocation7] sm:$0x3] %vm49_vm0, %v92_v11 }
  0x9e   :  { %104 = dma.vmem_to_hbm [thread:$0]  %s100_s25, 32, %s102_s28, [#allocation4]  }
  0x9f   :  { %196 = dma.done.wait [#allocation4], 32  }
  0xa0   :  { %197 = vsyncadd [#allocation4], 4294967264 }
  0xa1   :  { %109 = vsyncpa [#allocation3], 1 }
  0xa2   :  { %110 = vsyncpa [#allocation6], 1 }
  0xa3   :  { %111 = vsyncpa [#allocation4], 1 }

</bundles_post_ra>
